<compile_context>
chip_gen: v7x
topology: tpu7x:2x2x1
jax: 0.10.0
libtpu: 0.0.40
codegen_flags: <defaults>
</compile_context>

<pallas_src>
import functools

import jax
import jax.numpy as jnp
from jax.experimental import pallas as pl
from jax.experimental.pallas import tpu as pltpu


def _round_up(x, m):
    return ((x + m - 1) // m) * m


def nlinear_kernel(xm_ref, xr_ref, kt_ref, ks_ref, b_ref, o_ref, *, lowp):
    # xm/xr: (bt, L*C)   kt/ks: (L*C, O*T)   b: (1, O*T)   o: (bt, O*T)
    xm = xm_ref[...]
    xr = xr_ref[...]
    kt = kt_ref[...]
    ks = ks_ref[...]
    if lowp:
        # Single-pass bf16 MXU path (see review: v5e f32 emulation can become the
        # binding unit).  Cast in VMEM, never in the wrapper (no extra HBM pass).
        xm = xm.astype(jnp.bfloat16)
        xr = xr.astype(jnp.bfloat16)
        kt = kt.astype(jnp.bfloat16)
        ks = ks.astype(jnp.bfloat16)
    acc = jnp.dot(xm, kt, preferred_element_type=jnp.float32)
    acc = acc + jnp.dot(xr, ks, preferred_element_type=jnp.float32)
    o_ref[...] = (acc + b_ref[...]).astype(o_ref.dtype)


def ltsf_nlinear(x_mean, x_res, w_trend, b_trend, w_seasonal, b_seasonal,
                 w_last, b_last, *, block_b=4096, use_bf16_matmul=False):
    B, L, C = x_mean.shape
    O = w_trend.shape[0]
    T = w_last.shape[0]
    LC, OT = L * C, O * T

    # ---- fold all module algebra into two (L*C, O*T) matrices + one bias row ----
    f32 = jnp.float32
    onehot_last = jnp.zeros((O, L), f32).at[:, L - 1].set(1.0)
    wt_eff = w_trend.astype(f32) + onehot_last        # folds the `+ t_last` term
    ws_eff = w_seasonal.astype(f32) + onehot_last     # folds the `+ s_last` term
    # K[(l*C+c), (o*T+t)] = W_eff[o, l] * W_last[t, c]
    k_trend = jnp.einsum('ol,tc->lcot', wt_eff, w_last.astype(f32)).reshape(LC, OT)
    k_seasonal = jnp.einsum('ol,tc->lcot', ws_eff, w_last.astype(f32)).reshape(LC, OT)
    bias_out = ((b_trend + b_seasonal).astype(f32)[:, None]
                * jnp.sum(w_last.astype(f32), axis=1)[None, :]
                + b_last.astype(f32)[None, :]).reshape(1, OT)

    # ---- flatten (L, C) -> L*C (free reshape); keep the caller's dtype ----
    xm = x_mean.reshape(B, LC)
    xr = x_res.reshape(B, LC)

    # ---- batch tile: big (amortize ~0.35us/step), >=2 (even when possible) grid
    #      steps so v7x's 2 TensorCores both get work, sublane-aligned (x8).
    #      No wrapper-side padding: Pallas masks the partial final block. ----
    n_steps = max(2, pl.cdiv(B, max(block_b, 8)))
    if n_steps % 2:
        n_steps += 1
    bt = max(8, _round_up(pl.cdiv(B, n_steps), 8))
    grid = (pl.cdiv(B, bt),)

    # ---- explicit scoped-VMEM limit so the large tile also compiles on v5e
    #      (16 MiB default).  xm/xr double-buffered + out double-buffered + weights. ----
    in_itemsize = jnp.dtype(xm.dtype).itemsize
    out_itemsize = jnp.dtype(x_mean.dtype).itemsize
    vmem_need = (2 * 2 * bt * LC * in_itemsize        # two inputs, 2 buffers each
                 + 2 * bt * OT * out_itemsize         # output, 2 buffers
                 + 2 * LC * OT * 4 + OT * 4)          # resident fused weights + bias
    vmem_limit = int(min(max(vmem_need + (2 << 20), 32 << 20), 100 << 20))

    kernel = functools.partial(nlinear_kernel, lowp=use_bf16_matmul)

    out_flat = pl.pallas_call(
        kernel,
        out_shape=jax.ShapeDtypeStruct((B, OT), x_mean.dtype),
        grid_spec=pltpu.PrefetchScalarGridSpec(
            num_scalar_prefetch=0,
            grid=grid,
            in_specs=[
                pl.BlockSpec((bt, LC), lambda b: (b, 0)),    # x_mean tiles
                pl.BlockSpec((bt, LC), lambda b: (b, 0)),    # x_res tiles
                pl.BlockSpec((LC, OT), lambda b: (0, 0)),    # fused trend weights
                pl.BlockSpec((LC, OT), lambda b: (0, 0)),    # fused seasonal weights
                pl.BlockSpec((1, OT), lambda b: (0, 0)),     # fused bias row
            ],
            out_specs=pl.BlockSpec((bt, OT), lambda b: (b, 0)),
        ),
        compiler_params=pltpu.CompilerParams(
            dimension_semantics=("parallel",),
            vmem_limit_bytes=vmem_limit),
    )(xm, xr, k_trend, k_seasonal, bias_out)

    return out_flat.reshape(B, O, T)


def ltsf_nlinear_ref(x_mean, x_res, w_trend, b_trend, w_seasonal, b_seasonal,
                     w_last, b_last):
    # Pure-JAX reference mirroring the PyTorch forward exactly.
    t_last = x_mean[:, -1:, :]
    s_last = x_res[:, -1:, :]
    trend = jnp.einsum('blc,ol->boc', x_mean, w_trend) + b_trend[None, :, None] + t_last
    seasonal = jnp.einsum('blc,ol->boc', x_res, w_seasonal) + b_seasonal[None, :, None] + s_last
    x = trend + seasonal
    return jnp.einsum('boc,tc->bot', x, w_last) + b_last[None, None, :]


if __name__ == "__main__":
    # Module hyper-params (C is fixed to 27 by `last_linear = Linear(27, target_size)`)
    B = 2             # batch
    input_size = 8    # L: sequence length fed to Linear_Trend / Linear_Seasonal
    output_size = 8   # O: prediction horizon
    C = 27            # channels (hard-coded 27 in the module)
    target_size = 4   # T

    key = jax.random.PRNGKey(0)
    keys = jax.random.split(key, 8)

    x_mean = jax.random.normal(keys[0], (B, input_size, C), dtype=jnp.float32)
    x_res = jax.random.normal(keys[1], (B, input_size, C), dtype=jnp.float32)

    # Deterministic parameter init (PyTorch-Linear-style uniform bounds).
    bound_io = 1.0 / (input_size ** 0.5)
    bound_last = 1.0 / (27.0 ** 0.5)
    w_trend = jax.random.uniform(keys[2], (output_size, input_size),
                                 minval=-bound_io, maxval=bound_io, dtype=jnp.float32)
    b_trend = jax.random.uniform(keys[3], (output_size,),
                                 minval=-bound_io, maxval=bound_io, dtype=jnp.float32)
    w_seasonal = jax.random.uniform(keys[4], (output_size, input_size),
                                    minval=-bound_io, maxval=bound_io, dtype=jnp.float32)
    b_seasonal = jax.random.uniform(keys[5], (output_size,),
                                    minval=-bound_io, maxval=bound_io, dtype=jnp.float32)
    w_last = jax.random.uniform(keys[6], (target_size, 27),
                                minval=-bound_last, maxval=bound_last, dtype=jnp.float32)
    b_last = jax.random.uniform(keys[7], (target_size,),
                                minval=-bound_last, maxval=bound_last, dtype=jnp.float32)

    # Small batch: single grid step, bt > B (masked partial block).
    out = ltsf_nlinear(x_mean, x_res, w_trend, b_trend, w_seasonal, b_seasonal,
                       w_last, b_last)
    out = jax.block_until_ready(out)
    ref = ltsf_nlinear_ref(x_mean, x_res, w_trend, b_trend, w_seasonal, b_seasonal,
                           w_last, b_last)
    assert out.shape == (B, output_size, target_size)
    assert jnp.allclose(out, ref, atol=1e-4, rtol=1e-4)

    # Batch that needs a partial final block across a multi-step (parallel) grid,
    # with NO wrapper-side padding.
    B2 = 37
    xk = jax.random.split(keys[0], 2)
    x_mean2 = jax.random.normal(xk[0], (B2, input_size, C), dtype=jnp.float32)
    x_res2 = jax.random.normal(xk[1], (B2, input_size, C), dtype=jnp.float32)
    out2 = ltsf_nlinear(x_mean2, x_res2, w_trend, b_trend, w_seasonal, b_seasonal,
                        w_last, b_last, block_b=16)
    out2 = jax.block_until_ready(out2)
    ref2 = ltsf_nlinear_ref(x_mean2, x_res2, w_trend, b_trend, w_seasonal, b_seasonal,
                            w_last, b_last)
    assert jnp.allclose(out2, ref2, atol=1e-4, rtol=1e-4)

    # Optional low-precision MXU path (v5e compute-bound case); looser tolerance.
    out3 = ltsf_nlinear(x_mean2, x_res2, w_trend, b_trend, w_seasonal, b_seasonal,
                        w_last, b_last, block_b=16, use_bf16_matmul=True)
    out3 = jax.block_until_ready(out3)
    assert jnp.allclose(out3, ref2, atol=1e-1, rtol=1e-1)

    print("KERNEL_OK")
</pallas_src>

<mosaic_0001>
module attributes {stable_mosaic.version = 11 : i64} {
  func.func @nlinear_kernel(%arg0: i32, %arg1: memref<8x216xf32, #tpu.memory_space<vmem>>, %arg2: memref<8x216xf32, #tpu.memory_space<vmem>>, %arg3: memref<216x32xf32, #tpu.memory_space<vmem>>, %arg4: memref<216x32xf32, #tpu.memory_space<vmem>>, %arg5: memref<1x32xf32, #tpu.memory_space<vmem>>, %arg6: memref<8x32xf32, #tpu.memory_space<vmem>>) attributes {dimension_semantics = [#tpu.dimension_semantics<parallel>], iteration_bounds = array<i64: 1>, scalar_prefetch = 0 : i64, scratch_operands = 0 : i64, tpu.core_type = #tpu.core_type<tc>, window_params = [{transform_indices = @transform_0, window_bounds = array<i64: 8, 216>}, {transform_indices = @transform_1, window_bounds = array<i64: 8, 216>}, {pipeline_mode = #tpu.pipeline_mode<synchronous>, transform_indices = @transform_2, window_bounds = array<i64: 216, 32>}, {pipeline_mode = #tpu.pipeline_mode<synchronous>, transform_indices = @transform_3, window_bounds = array<i64: 216, 32>}, {pipeline_mode = #tpu.pipeline_mode<synchronous>, transform_indices = @transform_4, window_bounds = array<i64: 1, 32>}, {transform_indices = @transform_5, window_bounds = array<i64: 8, 32>}]} {
    %c0 = arith.constant 0 : index
    %c0_0 = arith.constant 0 : index
    %0 = vector.load %arg1[%c0, %c0_0] : memref<8x216xf32, #tpu.memory_space<vmem>>, vector<8x216xf32>
    %c0_1 = arith.constant 0 : index
    %c0_2 = arith.constant 0 : index
    %1 = vector.load %arg2[%c0_1, %c0_2] : memref<8x216xf32, #tpu.memory_space<vmem>>, vector<8x216xf32>
    %c0_3 = arith.constant 0 : index
    %c0_4 = arith.constant 0 : index
    %2 = vector.load %arg3[%c0_3, %c0_4] : memref<216x32xf32, #tpu.memory_space<vmem>>, vector<216x32xf32>
    %c0_5 = arith.constant 0 : index
    %c0_6 = arith.constant 0 : index
    %3 = vector.load %arg4[%c0_5, %c0_6] : memref<216x32xf32, #tpu.memory_space<vmem>>, vector<216x32xf32>
    %cst = arith.constant dense<0.000000e+00> : vector<8x32xf32>
    %4 = tpu.matmul %0, %2, %cst {dimension_numbers = #tpu.dot_dimension_numbers<[1], [0], [0], [1], [0, 0, 1, 1], [], []>} : vector<8x216xf32>, vector<216x32xf32>, vector<8x32xf32> -> vector<8x32xf32>
    %cst_7 = arith.constant dense<0.000000e+00> : vector<8x32xf32>
    %5 = tpu.matmul %1, %3, %cst_7 {dimension_numbers = #tpu.dot_dimension_numbers<[1], [0], [0], [1], [0, 0, 1, 1], [], []>} : vector<8x216xf32>, vector<216x32xf32>, vector<8x32xf32> -> vector<8x32xf32>
    %6 = arith.addf %4, %5 : vector<8x32xf32>
    %c0_8 = arith.constant 0 : index
    %c0_9 = arith.constant 0 : index
    %7 = vector.load %arg5[%c0_8, %c0_9] : memref<1x32xf32, #tpu.memory_space<vmem>>, vector<1x32xf32>
    %8 = vector.broadcast %7 : vector<1x32xf32> to vector<8x32xf32>
    %9 = arith.addf %6, %8 : vector<8x32xf32>
    %c0_10 = arith.constant 0 : index
    %c0_11 = arith.constant 0 : index
    %10 = vector.load %arg6[%c0_10, %c0_11] : memref<8x32xf32, #tpu.memory_space<vmem>>, vector<8x32xf32>
    tpu.vector_store %arg6[%c0_10, %c0_11], %9 {strides = array<i32>} : memref<8x32xf32, #tpu.memory_space<vmem>>, vector<8x32xf32>,
    return
  }
  func.func @transform_0(%arg0: i32) -> (i32, i32) {
    %c0_i32 = arith.constant 0 : i32
    %c0_i32_0 = arith.constant 0 : i32
    return %arg0, %c0_i32 : i32, i32
  }
  func.func @transform_1(%arg0: i32) -> (i32, i32) {
    %c0_i32 = arith.constant 0 : i32
    %c0_i32_0 = arith.constant 0 : i32
    return %arg0, %c0_i32 : i32, i32
  }
  func.func @transform_2(%arg0: i32) -> (i32, i32) {
    %c0_i32 = arith.constant 0 : i32
    %c0_i32_0 = arith.constant 0 : i32
    %c0_i32_1 = arith.constant 0 : i32
    return %c0_i32, %c0_i32_0 : i32, i32
  }
  func.func @transform_3(%arg0: i32) -> (i32, i32) {
    %c0_i32 = arith.constant 0 : i32
    %c0_i32_0 = arith.constant 0 : i32
    %c0_i32_1 = arith.constant 0 : i32
    return %c0_i32, %c0_i32_0 : i32, i32
  }
  func.func @transform_4(%arg0: i32) -> (i32, i32) {
    %c0_i32 = arith.constant 0 : i32
    %c0_i32_0 = arith.constant 0 : i32
    %c0_i32_1 = arith.constant 0 : i32
    return %c0_i32, %c0_i32_0 : i32, i32
  }
  func.func @transform_5(%arg0: i32) -> (i32, i32) {
    %c0_i32 = arith.constant 0 : i32
    %c0_i32_0 = arith.constant 0 : i32
    return %arg0, %c0_i32 : i32, i32
  }
}

</mosaic_0001>

<bundles_post_ra>
// kernel: tpu_custom_call.1
= control target key start
LH: loop header
LB: loop body
LE: loop exit
PB: predicated region body
PF: predicated region fallthrough
CT: control target
= control target key end

     0   :  { %10 = vsyncpa [#allocation3], 0  ;;  %v419_v2 = vmov 0.0|0.0   ;;  %vm106_vm0 = vcmask 719872   ;;  %vm282_vm1 = vcmask 261120   ;;  %s687_s0 = inlined_call_operand.vmem [shape: f32[2,216], index: 0, kind: input, shape index: {}]   ;;  %s688_s1 = inlined_call_operand.vmem [shape: f32[2,216], index: 1, kind: input, shape index: {}]   ;;  %s689_s2 = inlined_call_operand.vmem [shape: f32[216,32], index: 2, kind: input, shape index: {}]   ;;  %s690_s3 = inlined_call_operand.vmem [shape: f32[216,32], index: 3, kind: input, shape index: {}]   ;;  %s691_s4 = inlined_call_operand.vmem [shape: f32[1,32], index: 4, kind: input, shape index: {}]   ;;  %s692_s5 = inlined_call_operand.hbm [shape: f32[2,32], index: 5, kind: output, shape index: {}]  }
   0x1   :  { %v56_v0 = vld [vmem:[%s690_s3] sm:$0xff]  ;;  %v57_v1 = vld [vmem:[%s690_s3 + $0x8] sm:$0xff]  ;;  %303 = vmatprep.subr.bf16.mxu0 %v419_v2  ;;  %342 = vmatprep.subr.bf16.mxu1 %v419_v2  ;;  %v58_v6 = vld [vmem:[%s690_s3 + $0x10] sm:$0xff] }
   0x2   :  { %v304_v3 = vpack.c.bf16 %v57_v1, %v56_v0  ;;  %v29_v4 = vld [vmem:[%s689_s2] sm:$0xff]  ;;  %v30_v5 = vld [vmem:[%s689_s2 + $0x8] sm:$0xff]  ;;  %v59_v8 = vld [vmem:[%s690_s3 + $0x18] sm:$0xff] }
   0x3   :  { %v343_v7 = vpack.c.bf16 %v30_v5, %v29_v4  ;;  %v31_v9 = vld [vmem:[%s689_s2 + $0x10] sm:$0xff]  ;;  %v32_v10 = vld [vmem:[%s689_s2 + $0x18] sm:$0xff]  ;;  %v307_v11 = vpack.c.bf16 %v59_v8, %v58_v6  ;;  %v60_v13 = vld [vmem:[%s690_s3 + $0x20] sm:$0xff] }
   0x4   :  { %305 = vmatpush1.bf16.msra.mxu0 %v304_v3  ;;  %v346_v12 = vpack.c.bf16 %v32_v10, %v31_v9  ;;  %v61_v14 = vld [vmem:[%s690_s3 + $0x28] sm:$0xff]  ;;  %v33_v15 = vld [vmem:[%s689_s2 + $0x20] sm:$0xff]  ;;  %v62_v19 = vld [vmem:[%s690_s3 + $0x30] sm:$0xff] }
   0x5   :  { %344 = vmatpush1.bf16.msra.mxu1 %v343_v7  ;;  %306 = vmatprep.subr.bf16.mxu0 %v419_v2  ;;  %v34_v16 = vld [vmem:[%s689_s2 + $0x28] sm:$0xff]  ;;  %v310_v17 = vpack.c.bf16 %v61_v14, %v60_v13  ;;  %v63_v20 = vld [vmem:[%s690_s3 + $0x38] sm:$0xff]  ;;  %v35_v21 = vld [vmem:[%s689_s2 + $0x30] sm:$0xff] }
   0x6   :  { %345 = vmatprep.subr.bf16.mxu1 %v419_v2  ;;  %v349_v18 = vpack.c.bf16 %v34_v16, %v33_v15  ;;  %v36_v22 = vld [vmem:[%s689_s2 + $0x38] sm:$0xff]  ;;  %v313_v23 = vpack.c.bf16 %v63_v20, %v62_v19  ;;  %v64_v25 = vld [vmem:[%s690_s3 + $0x40] sm:$0xff]  ;;  %v65_v26 = vld [vmem:[%s690_s3 + $0x48] sm:$0xff] }
   0x7   :  { %v352_v24 = vpack.c.bf16 %v36_v22, %v35_v21  ;;  %v37_v27 = vld [vmem:[%s689_s2 + $0x40] sm:$0xff]  ;;  %v38_v28 = vld [vmem:[%s689_s2 + $0x48] sm:$0xff]  ;;  %v316_v29 = vpack.c.bf16 %v65_v26, %v64_v25  ;;  %v66_v31 = vld [vmem:[%s690_s3 + $0x50] sm:$0xff]  ;;  %v420_v22 = vmov 0.0  }
   0x8   :  { %308 = vmatpush1.bf16.msra.mxu0 %v307_v11  ;;  %v355_v30 = vpack.c.bf16 %v38_v28, %v37_v27  ;;  %v67_v32 = vld [vmem:[%s690_s3 + $0x58] sm:$0xff]  ;;  %v39_v33 = vld [vmem:[%s689_s2 + $0x50] sm:$0xff]  ;;  %v68_v35 = vld [vmem:[%s690_s3 + $0x60] sm:$0xff] }
   0x9   :  { %347 = vmatpush1.bf16.msra.mxu1 %v346_v12  ;;  %309 = vmatprep.subr.bf16.mxu0 %v419_v2  ;;  %v40_v34 = vld [vmem:[%s689_s2 + $0x58] sm:$0xff]  ;;  %v69_v36 = vld [vmem:[%s690_s3 + $0x68] sm:$0xff]  ;;  %v319_v37 = vpack.c.bf16 %v67_v32, %v66_v31  ;;  %v41_v38 = vld [vmem:[%s689_s2 + $0x60] sm:$0xff] }
   0xa   :  { %348 = vmatprep.subr.bf16.mxu1 %v419_v2  ;;  %v548_v39 = vld.sshfl [vmem:[%s688_s1] sm:$0xff pattern:$0x76325410]  ;;  %v553_v40 = vld.sshfl [vmem:[%s688_s1 + $0x8] sm:$0xff pattern:$0x76325410]  ;;  %v358_v41 = vpack.c.bf16 %v40_v34, %v39_v33  ;;  %v322_v45 = vpack.c.bf16 %v69_v36, %v68_v35 }
   0xb   :  { %v42_v42 = vld [vmem:[%s689_s2 + $0x68] sm:$0xff]  ;;  %v563_v43 = vld.sshfl [vmem:[%s687_s0] sm:$0xff pattern:$0x76325410]  ;;  %v104_v46 = vcombine.high %v548_v39, %v553_v40  ;;  %v70_v48 = vld [vmem:[%s690_s3 + $0x70] sm:$0xff] }
   0xc   :  { %311 = vmatpush1.bf16.msra.mxu0 %v310_v17  ;;  %v568_v44 = vld.sshfl [vmem:[%s687_s0 + $0x8] sm:$0xff pattern:$0x76325410]  ;;  %v361_v47 = vpack.c.bf16 %v42_v42, %v41_v38  ;;  %v71_v49 = vld [vmem:[%s690_s3 + $0x78] sm:$0xff]  ;;  %v43_v50 = vld [vmem:[%s689_s2 + $0x70] sm:$0xff] }
   0xd   :  { %350 = vmatpush1.bf16.msra.mxu1 %v349_v18  ;;  %312 = vmatprep.subr.bf16.mxu0 %v419_v2  ;;  %v44_v51 = vld [vmem:[%s689_s2 + $0x78] sm:$0xff]  ;;  %v200_v52 = vcombine.high %v563_v43, %v568_v44  ;;  %v325_v53 = vpack.c.bf16 %v71_v49, %v70_v48  ;;  %v72_v55 = vld [vmem:[%s690_s3 + $0x80] sm:$0xff]  ;;  %v73_v56 = vld [vmem:[%s690_s3 + $0x88] sm:$0xff]  ;;  %v199_v26 = vcombine.low %v563_v43, %v568_v44 }
   0xe   :  { %351 = vmatprep.subr.bf16.mxu1 %v419_v2  ;;  %300 = vmatprep.mubr.msk.f32.mxu0 %vm106_vm0, %v104_v46  ;;  %v364_v54 = vpack.c.bf16 %v44_v51, %v43_v50  ;;  %v45_v57 = vld [vmem:[%s689_s2 + $0x80] sm:$0xff]  ;;  %v46_v58 = vld [vmem:[%s689_s2 + $0x88] sm:$0xff]  ;;  %v328_v59 = vpack.c.bf16 %v73_v56, %v72_v55  ;;  %v74_v61 = vld [vmem:[%s690_s3 + $0x90] sm:$0xff] }
   0xf   :  { %301 = vmatprep.mubr.msk.f32.mxu1 %vm106_vm0, %v200_v52  ;;  %v367_v60 = vpack.c.bf16 %v46_v58, %v45_v57  ;;  %v75_v62 = vld [vmem:[%s690_s3 + $0x98] sm:$0xff]  ;;  %v47_v63 = vld [vmem:[%s689_s2 + $0x90] sm:$0xff]  ;;  %v76_v4 = vld [vmem:[%s690_s3 + $0xa0] sm:$0xff] }
  0x10   :  { %314 = vmatpush1.bf16.msra.mxu0 %v313_v23  ;;  %v48_v0 = vld [vmem:[%s689_s2 + $0x98] sm:$0xff]  ;;  %v331_v1 = vpack.c.bf16 %v75_v62, %v74_v61  ;;  %v77_v5 = vld [vmem:[%s690_s3 + $0xa8] sm:$0xff]  ;;  %v49_v6 = vld [vmem:[%s689_s2 + $0xa0] sm:$0xff] }
  0x11   :  { %353 = vmatpush1.bf16.msra.mxu1 %v352_v24  ;;  %315 = vmatprep.subr.bf16.mxu0 %v419_v2  ;;  %v370_v3 = vpack.c.bf16 %v48_v0, %v47_v63  ;;  %v50_v7 = vld [vmem:[%s689_s2 + $0xa8] sm:$0xff]  ;;  %v334_v8 = vpack.c.bf16 %v77_v5, %v76_v4  ;;  %v78_v10 = vld [vmem:[%s690_s3 + $0xb0] sm:$0xff]  ;;  %v79_v11 = vld [vmem:[%s690_s3 + $0xb8] sm:$0xff]  ;;  %v103_v24 = vcombine.low %v548_v39, %v553_v40 }
  0x12   :  { %354 = vmatprep.subr.bf16.mxu1 %v419_v2  ;;  %v373_v9 = vpack.c.bf16 %v50_v7, %v49_v6  ;;  %v51_v12 = vld [vmem:[%s689_s2 + $0xb0] sm:$0xff]  ;;  %v52_v13 = vld [vmem:[%s689_s2 + $0xb8] sm:$0xff]  ;;  %v337_v14 = vpack.c.bf16 %v79_v11, %v78_v10  ;;  %v80_v16 = vld [vmem:[%s690_s3 + $0xc0] sm:$0xff] }
  0x13   :  { %v376_v15 = vpack.c.bf16 %v52_v13, %v51_v12  ;;  %v81_v17 = vld [vmem:[%s690_s3 + $0xc8] sm:$0xff]  ;;  %v53_v18 = vld [vmem:[%s689_s2 + $0xc0] sm:$0xff]  ;;  %v82_v23 = vld [vmem:[%s690_s3 + $0xd0] sm:$0xff] }
  0x14   :  { %317 = vmatpush1.bf16.msra.mxu0 %v316_v29  ;;  %v54_v19 = vld [vmem:[%s689_s2 + $0xc8] sm:$0xff]  ;;  %v340_v20 = vpack.c.bf16 %v81_v17, %v80_v16  ;;  %v55_v25 = vld [vmem:[%s689_s2 + $0xd0] sm:$0xff]  ;;  %v302_v28 = vld [vmem:[%s691_s4] ss:$0 sm:$0xff] }
  0x15   :  { %356 = vmatpush1.bf16.msra.mxu1 %v355_v30  ;;  %318 = vmatprep.subr.bf16.mxu0 %v419_v2  ;;  %v379_v21 = vpack.c.bf16 %v54_v19, %v53_v18 }
  0x16   :  { %357 = vmatprep.subr.bf16.mxu1 %v419_v2 }
  0x18   :  { %320 = vmatpush1.bf16.msra.mxu0 %v319_v37 }
  0x19   :  { %359 = vmatpush1.bf16.msra.mxu1 %v358_v41  ;;  %321 = vmatprep.subr.bf16.mxu0 %v419_v2 }
  0x1a   :  { %360 = vmatprep.subr.bf16.mxu1 %v419_v2 }
  0x1c   :  { %323 = vmatpush1.bf16.msra.mxu0 %v322_v45 }
  0x1d   :  { %362 = vmatpush1.bf16.msra.mxu1 %v361_v47  ;;  %324 = vmatprep.subr.bf16.mxu0 %v419_v2 }
  0x1e   :  { %363 = vmatprep.subr.bf16.mxu1 %v419_v2 }
  0x20   :  { %326 = vmatpush1.bf16.msra.mxu0 %v325_v53 }
  0x21   :  { %365 = vmatpush1.bf16.msra.mxu1 %v364_v54  ;;  %327 = vmatprep.subr.bf16.mxu0 %v419_v2 }
  0x22   :  { %366 = vmatprep.subr.bf16.mxu1 %v419_v2 }
  0x24   :  { %329 = vmatpush1.bf16.msra.mxu0 %v328_v59 }
  0x25   :  { %368 = vmatpush1.bf16.msra.mxu1 %v367_v60  ;;  %330 = vmatprep.subr.bf16.mxu0 %v419_v2 }
  0x26   :  { %369 = vmatprep.subr.bf16.mxu1 %v419_v2 }
  0x28   :  { %332 = vmatpush1.bf16.msra.mxu0 %v331_v1 }
  0x29   :  { %371 = vmatpush1.bf16.msra.mxu1 %v370_v3  ;;  %333 = vmatprep.subr.bf16.mxu0 %v419_v2 }
  0x2a   :  { %372 = vmatprep.subr.bf16.mxu1 %v419_v2 }
  0x2c   :  { %335 = vmatpush1.bf16.msra.mxu0 %v334_v8 }
  0x2d   :  { %374 = vmatpush1.bf16.msra.mxu1 %v373_v9  ;;  %336 = vmatprep.subr.bf16.mxu0 %v419_v2 }
  0x2e   :  { %375 = vmatprep.subr.bf16.mxu1 %v419_v2 }
  0x30   :  { %338 = vmatpush1.bf16.msra.mxu0 %v337_v14 }
  0x31   :  { %377 = vmatpush1.bf16.msra.mxu1 %v376_v15  ;;  %339 = vmatprep.subr.bf16.mxu0 %v419_v2 }
  0x32   :  { %378 = vmatprep.subr.bf16.mxu1 %v419_v2 }
  0x34   :  { %341 = vmatpush1.bf16.msra.mxu0 %v340_v20 }
  0x35   :  { %380 = vmatpush1.bf16.msra.mxu1 %v379_v21  ;;  %161 = vmatprep.subr.mxu0 %v420_v22 }
  0x36   :  { %256 = vmatprep.subr.mxu1 %v420_v22 }
  0x38   :  { %162 = vmatpush1.msra.mxu0 %v82_v23 }
  0x39   :  { %257 = vmatpush1.msra.mxu1 %v55_v25  ;;  %174 = vmatmul.mubr.f32.vlgmr.msra.gmra.mrb[0].mxu0 %v103_v24 }
  0x3a   :  { %269 = vmatmul.mubr.f32.vlgmr.msra.gmra.mrb[0].mxu1 %v199_v26 }
 0x10c   :  { %v175_v2 = vpop.f32.mrb[0].mxu0 }
 0x10d   :  { %v270_v27 = vpop.f32.mrb[0].mxu1  ;;  %v177_v29 = vpop.f32.mrb[1].mxu0 }
 0x10e   :  { %v271_v30 = vadd.f32 %v270_v27, %v175_v2  ;;  %v272_v31 = vpop.f32.mrb[1].mxu1 }
 0x110   :  { %v281_v32 = vadd.f32 %v302_v28, %v271_v30 }
 0x112   :  { %283 = vst.msk [vmem:[#allocation2] sm:$0xff] %vm282_vm1, %v281_v32 }
 0x113   :  { %288 = vsyncadd [#allocation3], 96  ;;  %s421_s2 = smov [#allocation2]  }
 0x114   :  { %s289_s3 = sshll.u32 %s421_s2, 4  ;;  %s290_s3 = int_to_ptr.vmem [resolvable:$true] %s289_s3 }
 0x115   :  { %s395_s1 = scalar_lea.vmem %s290_s3, 32  ;;  %s399_s7 = scalar_lea.vmem %s290_s3, 128 }
 0x116   :  { %p396_p0 = scmp.ne.s32.totalorder %s290_s3, %s395_s1  ;;  %p400_p1 = scmp.lt.s32.totalorder %s290_s3, %s290_s3 }
 0x117   :  { %p401_p2 = scmp.lt.s32.totalorder %s399_s7, %s395_s1 }
 0x119   :  { %p402_p3 = por %p401_p2, %p400_p1 }
 0x11b   :  { %p403_p4 = pnand %p402_p3, %p396_p0 }
 0x11d   :  { %406 = shalt.err (!%p403_p4)
}
 0x11e   :  { %s407_s9 = scalar_lea.hbm %s692_s5, 32 }
 0x11f   :  { %p408_p5 = scmp.ne.s32.totalorder %s692_s5, %s407_s9  ;;  %p411_p6 = scmp.lt.u32.totalorder %s407_s9, %s692_s5 }
 0x121   :  { %p413_p7 = pnand %p411_p6, %p408_p5 }
 0x123   :  { %416 = shalt.err (!%p413_p7)
}
 0x124   :  { %s422_s13 = smov 32   ;;  %s423_s14 = smov 2  }
 0x125   :  { %295 = dma.vmem_to_hbm [thread:$0]  %s290_s3, 32, %s692_s5, [#allocation3], %s422_s13, %s422_s13, %s423_s14  }
 0x126   :  { %417 = dma.done.wait [#allocation3], 128  }
 0x127   :  { %418 = vsyncadd [#allocation3], 4294967168 }
 0x128   :  { %299 = vsyncpa [#allocation3], 1 }

</bundles_post_ra>
